<compile_context>
chip_gen: v5e
topology: v5e:2x2
jax: 0.10.0
libtpu: 0.0.40
codegen_flags: <defaults>
</compile_context>

<pallas_src>
import functools

import jax
import jax.numpy as jnp
from jax.experimental import pallas as pl
from jax.experimental.pallas import tpu as pltpu


def _sin_feature_kernel(x_ref, o_ref):
    # x_ref / o_ref: lane-dense [tile_rows, lanes] blocks in VMEM.
    x = x_ref[...].astype(jnp.float32)
    o_ref[...] = jnp.sin(jnp.pi * x).astype(o_ref.dtype)


def _round_up(v: int, m: int) -> int:
    return ((v + m - 1) // m) * m


@functools.partial(jax.jit, static_argnames=("label_idx", "lanes", "tile_rows"))
def _my_feature_impl(pts, *, label_idx: int, lanes: int, tile_rows: int):
    n, _ = pts.shape

    # Adaptive lane width: multiple of 128, capped at `lanes`, sized ~n/8 so
    # small inputs are not blown up by padding while stores stay unmasked.
    lanes_eff = max(128, min(lanes, _round_up(pl.cdiv(max(n, 1), 8), 128)))

    # Pad only to a whole number of lanes (no rows padding); the final
    # row-block may overhang the slab — Pallas masks those OOB writes and the
    # garbage lanes are sliced off below.
    rows = pl.cdiv(n, lanes_eff)
    n_pad = rows * lanes_eff

    col = pts[:, label_idx]                        # the 'x' column, [N]
    if n_pad != n:
        col = jnp.pad(col, (0, n_pad - n))
    slab = col.reshape(rows, lanes_eff)            # lane-dense [rows, lanes_eff]

    # Row-tile: multiple of 8 (sublane) unless it spans the full row dim.
    # Target >= 2 grid steps so the "parallel" axis shards across both v7x TCs.
    tile_rows_eff = min(tile_rows, max(8, _round_up(pl.cdiv(rows, 2), 8)))
    if tile_rows_eff >= rows:
        tile_rows_eff = rows                       # single full-extent block
    grid = pl.cdiv(rows, tile_rows_eff)

    out_slab = pl.pallas_call(
        _sin_feature_kernel,
        out_shape=jax.ShapeDtypeStruct((rows, lanes_eff), pts.dtype),
        grid_spec=pl.GridSpec(
            grid=(grid,),
            in_specs=[pl.BlockSpec((tile_rows_eff, lanes_eff), lambda i: (i, 0))],
            out_specs=pl.BlockSpec((tile_rows_eff, lanes_eff), lambda i: (i, 0)),
        ),
        compiler_params=pltpu.CompilerParams(
            dimension_semantics=("parallel",),
            # Allow XLA to fuse the column-extract/pad/reshape producer into
            # the pallas_call operand (no standalone slab in HBM).
            allow_input_fusion=[True],
        ),
    )(slab)

    # Back to LabelTensor layout [N, 1]; under jit this folds into the output
    # fusion of the custom call (single HBM pass out).
    return out_slab.reshape(-1)[:n].reshape(n, 1)


def my_feature(pts: jax.Array, labels, *, lanes: int = 512,
               tile_rows: int = 1024) -> jax.Array:
    """sin(pi * pts[:, labels.index('x')]) as an [N, 1] array (label 'sin(x)')."""
    assert pts.ndim == 2, "expected a LabelTensor-like [N, D] array"
    # TODO(synk): LabelTensor label bookkeeping ('sin(x)') has no array
    # equivalent; the result is returned as a plain [N, 1] array.
    return _my_feature_impl(pts, label_idx=labels.index('x'),
                            lanes=lanes, tile_rows=tile_rows)


if __name__ == "__main__":
    key = jax.random.PRNGKey(0)
    N, D = 256, 2                       # columns labeled ['x', 't']
    labels = ['x', 't']
    pts = jax.random.uniform(key, (N, D), dtype=jnp.float32,
                             minval=-1.0, maxval=1.0)

    out = my_feature(pts, labels)
    jax.block_until_ready(out)

    # Pure-JAX reference check (sin(pi * x_column)).
    idx = labels.index('x')
    ref = jnp.sin(jnp.pi * pts[:, idx:idx + 1])
    assert out.shape == (N, 1)
    assert jnp.allclose(out, ref, atol=1e-6, rtol=1e-6)

    print("KERNEL_OK")
</pallas_src>

<mosaic_0001>
module attributes {stable_mosaic.version = 11 : i64} {
  func.func @_sin_feature_kernel(%arg0: i32, %arg1: memref<2x128xf32, #tpu.memory_space<vmem>>, %arg2: memref<2x128xf32, #tpu.memory_space<vmem>>) attributes {dimension_semantics = [#tpu.dimension_semantics<parallel>], iteration_bounds = array<i64: 1>, scalar_prefetch = 0 : i64, scratch_operands = 0 : i64, tpu.core_type = #tpu.core_type<tc>, window_params = [{transform_indices = @transform_0, window_bounds = array<i64: 2, 128>}, {transform_indices = @transform_1, window_bounds = array<i64: 2, 128>}]} {
    %c0 = arith.constant 0 : index
    %c0_0 = arith.constant 0 : index
    %0 = vector.load %arg1[%c0, %c0_0] : memref<2x128xf32, #tpu.memory_space<vmem>>, vector<2x128xf32>
    %cst = arith.constant 3.14159274 : f32
    %1 = vector.broadcast %cst : f32 to vector<2x128xf32>
    %2 = arith.mulf %1, %0 : vector<2x128xf32>
    %3 = math.sin %2 : vector<2x128xf32>
    %c0_1 = arith.constant 0 : index
    %c0_2 = arith.constant 0 : index
    %4 = vector.load %arg2[%c0_1, %c0_2] : memref<2x128xf32, #tpu.memory_space<vmem>>, vector<2x128xf32>
    tpu.vector_store %arg2[%c0_1, %c0_2], %3 {strides = array<i32>} : memref<2x128xf32, #tpu.memory_space<vmem>>, vector<2x128xf32>,
    return
  }
  func.func @transform_0(%arg0: i32) -> (i32, i32) {
    %c0_i32 = arith.constant 0 : i32
    %c0_i32_0 = arith.constant 0 : i32
    return %arg0, %c0_i32 : i32, i32
  }
  func.func @transform_1(%arg0: i32) -> (i32, i32) {
    %c0_i32 = arith.constant 0 : i32
    %c0_i32_0 = arith.constant 0 : i32
    return %arg0, %c0_i32 : i32, i32
  }
}

</mosaic_0001>

<bundles_post_ra>
// kernel: _my_feature_impl.1
= control target key start
LH: loop header
LB: loop body
LE: loop exit
PB: predicated region body
PF: predicated region fallthrough
CT: control target
= control target key end

     0   :  { %6 = vsyncpa [#allocation3], 0  ;;  %v220_v13 = vmov 683565275   ;;  %v221_v15 = vmov 2475754826   ;;  %s290_s0 = inlined_call_operand.vmem [shape: f32[2,128], index: 0, kind: input, shape index: {}]   ;;  %s291_s1 = inlined_call_operand.hbm [shape: f32[2,128], index: 1, kind: output, shape index: {}]  }
   0x1   :  { %v9_v0 = vld [vmem:[%s290_s0] sm:$0x3]  ;;  %v222_v17 = vmov 2131351028   ;;  %v223_v19 = vmov 2102212464  }
   0x2   :  { %v241_v1 = vmul.f32 3.1415927, %v9_v0  ;;  %v224_v21 = vmov 920167782   ;;  %v225_v27 = vmov 1326507024  }
   0x3   :  { %s227_s0 = smov [#allocation2]   ;;  %s174_s11 = sshll.u32 %s291_s1, 4  ;;  %s175_s11 = int_to_ptr.hbm [resolvable:$true] %s174_s11 }
   0x4   :  { %v14_v2 = vand.u32 2139095040, %v241_v1  ;;  %v11_v4 = vand.u32 2147483647, %v241_v1  ;;  %vm13_vm12 = vcmp.lt.s32.totalorder %v241_v1, 0  ;;  %s172_s8 = sshll.u32 %s227_s0, 4  ;;  %s173_s8 = int_to_ptr.vmem [resolvable:$true] %s172_s8 }
   0x6   :  { %v15_v3 = vshrl.u32 %v14_v2, 23  ;;  %v18_v7 = vand.u32 8388607, %v11_v4  ;;  %v226_v2 = vmov 0   ;;  %vm12_vm13 = vcmp.le.f32.partialorder %v11_v4, 0.7853982 }
   0x8   :  { %v183_v5 = vadd.s32 4294967169, %v15_v3  ;;  %v19_v10 = vor.u32 8388608, %v18_v7 }
   0xa   :  { %v21_v6 = vadd.s32 1, %v183_v5  ;;  %v250_v29 = vshll.u32 %v19_v10, 8 }
   0xc   :  { %vm22_vm0 = vcmp.gt.s32.totalorder %v21_v6, 0  ;;  %v60_v41 = vand.u32 65535, %v250_v29  ;;  %v61_v42 = vshrl.u32 %v250_v29, 16 }
   0xd   :  { %v23_v8 = vsel %vm22_vm0, %v21_v6, 0 }
   0xe   :  { %v25_v9 = vand.u32 31, %v23_v8  ;;  %v247_v11 = vshrl.u32 %v23_v8, 5 }
  0x10   :  { %v26_v12 = vsub.s32 32, %v25_v9  ;;  %v28_v14 = vshll.u32 %v220_v13, %v25_v9  ;;  %v31_v16 = vshll.u32 %v221_v15, %v25_v9  ;;  %v34_v18 = vshll.u32 %v222_v17, %v25_v9 }
  0x11   :  { %v37_v20 = vshll.u32 %v223_v19, %v25_v9  ;;  %v40_v22 = vshll.u32 %v224_v21, %v25_v9  ;;  %vm43_vm1 = vcmp.lt.s32.totalorder %v247_v11, 1  ;;  %vm46_vm2 = vcmp.lt.s32.totalorder %v247_v11, 4 }
  0x12   :  { %v29_v23 = vshrl.u32 %v221_v15, %v26_v12  ;;  %v32_v24 = vshrl.u32 %v222_v17, %v26_v12  ;;  %v35_v25 = vshrl.u32 %v223_v19, %v26_v12  ;;  %v38_v26 = vshrl.u32 %v224_v21, %v26_v12 }
  0x13   :  { %v41_v28 = vshrl.u32 %v225_v27, %v26_v12  ;;  %vm45_vm3 = vcmp.lt.s32.totalorder %v247_v11, 3  ;;  %vm44_vm4 = vcmp.lt.s32.totalorder %v247_v11, 2  ;;  %v27_v49 = vshrl.u32 %v220_v13, %v26_v12 }
  0x14   :  { %v30_v30 = vor.u32 %v29_v23, %v28_v14  ;;  %v33_v31 = vor.u32 %v32_v24, %v31_v16  ;;  %v36_v32 = vor.u32 %v35_v25, %v34_v18  ;;  %v39_v33 = vor.u32 %v38_v26, %v37_v20 }
  0x15   :  { %v42_v34 = vor.u32 %v41_v28, %v40_v22 }
  0x16   :  { %v51_v35 = vsel %vm43_vm1, %v30_v30, %v33_v31  ;;  %v55_v36 = vsel %vm43_vm1, %v33_v31, %v36_v32  ;;  %v52_v37 = vsel %vm46_vm2, %v39_v33, 920167782  ;;  %v47_v62 = vsel %vm43_vm1, %v27_v49, %v30_v30 }
  0x17   :  { %v56_v38 = vsel %vm46_vm2, %v42_v34, 1326507024  ;;  %v53_v39 = vsel %vm45_vm3, %v36_v32, %v52_v37  ;;  %v48_v0 = vsel %vm46_vm2, %v36_v32, 2102212464  ;;  %vm154_vm1 = vweird.f32 %v241_v1 }
  0x18   :  { %v57_v40 = vsel %vm45_vm3, %v39_v33, %v56_v38  ;;  %v54_v43 = vsel %vm44_vm4, %v51_v35, %v53_v39  ;;  %v49_v13 = vsel %vm45_vm3, %v33_v31, %v48_v0 }
  0x19   :  { %v58_v44 = vsel %vm44_vm4, %v55_v36, %v57_v40  ;;  %v84_v47 = vand.u32 65535, %v54_v43  ;;  %v85_v48 = vshrl.u32 %v54_v43, 16  ;;  %v50_v21 = vsel %vm44_vm4, %v47_v62, %v49_v13 }
  0x1a   :  { %v62_v45 = vand.u32 65535, %v58_v44  ;;  %v63_v46 = vshrl.u32 %v58_v44, 16  ;;  %v104_v25 = vmul.u32 %v250_v29, %v50_v21 }
  0x1b   :  { %v86_v53 = vmul.u32 %v84_v47, %v60_v41  ;;  %v87_v54 = vmul.u32 %v85_v48, %v60_v41  ;;  %v88_v55 = vmul.u32 %v84_v47, %v61_v42  ;;  %v89_v59 = vmul.u32 %v85_v48, %v61_v42 }
  0x1c   :  { %v64_v50 = vmul.u32 %v62_v45, %v60_v41  ;;  %v65_v51 = vmul.u32 %v63_v46, %v60_v41  ;;  %v66_v52 = vmul.u32 %v62_v45, %v61_v42  ;;  %v67_v56 = vmul.u32 %v63_v46, %v61_v42 }
  0x1d   :  { %v90_v60 = vshll.u32 %v87_v54, 16  ;;  %v92_v61 = vshll.u32 %v88_v55, 16  ;;  %v91_v10 = vshrl.u32 %v87_v54, 16  ;;  %v93_v17 = vshrl.u32 %v88_v55, 16 }
  0x1e   :  { %v68_v57 = vshll.u32 %v65_v51, 16  ;;  %v70_v58 = vshll.u32 %v66_v52, 16  ;;  %v69_v6 = vshrl.u32 %v65_v51, 16  ;;  %v71_v14 = vshrl.u32 %v66_v52, 16 }
  0x1f   :  { %vm94_vm6 = vc.u32 %v86_v53, %v90_v60  ;;  %v96_v5 = vadd.s32 %v90_v60, %v86_v53 }
  0x20   :  { %vm72_vm5 = vc.u32 %v64_v50, %v68_v57  ;;  %v74_v63 = vadd.s32 %v68_v57, %v64_v50  ;;  %v95_v8 = vsel %vm94_vm6, 1, %v226_v2 }
  0x21   :  { %v73_v3 = vsel %vm72_vm5, 1, %v226_v2  ;;  %v97_v12 = vadd.s32 %v95_v8, %v89_v59  ;;  %vm98_vm8 = vc.u32 %v96_v5, %v92_v61  ;;  %v100_v20 = vadd.s32 %v96_v5, %v92_v61 }
  0x22   :  { %v75_v7 = vadd.s32 %v73_v3, %v67_v56  ;;  %vm76_vm7 = vc.u32 %v74_v63, %v70_v58  ;;  %v99_v16 = vsel %vm98_vm8, 1, %v226_v2 }
  0x23   :  { %v77_v9 = vsel %vm76_vm7, 1, %v226_v2  ;;  %v101_v18 = vadd.s32 %v99_v16, %v97_v12 }
  0x24   :  { %v79_v15 = vadd.s32 %v77_v9, %v75_v7 }
  0x25   :  { %v102_v22 = vadd.s32 %v101_v18, %v91_v10 }
  0x26   :  { %v80_v19 = vadd.s32 %v79_v15, %v69_v6 }
  0x27   :  { %v103_v24 = vadd.s32 %v102_v22, %v93_v17 }
  0x28   :  { %v81_v23 = vadd.s32 %v80_v19, %v71_v14 }
  0x29   :  { %v107_v26 = vadd.s32 1, %v103_v24 }
  0x2a   :  { %vm106_vm9 = vc.u32 %v81_v23, %v100_v20  ;;  %v105_v11 = vadd.s32 %v100_v20, %v81_v23 }
  0x2b   :  { %v108_v27 = vsel %vm106_vm9, %v107_v26, %v103_v24 }
  0x2c   :  { %v109_v28 = vadd.s32 %v108_v27, %v104_v25 }
  0x2e   :  { %v110_v30 = vadd.s32 536870912, %v109_v28 }
  0x30   :  { %v111_v31 = vshrl.u32 %v110_v30, 30 }
  0x32   :  { %v112_v32 = vshll.u32 %v111_v31, 30  ;;  %v135_v49 = vsub.s32 4, %v111_v31 }
  0x34   :  { %v113_v33 = vsub.s32 %v109_v28, %v112_v32  ;;  %v136_v52 = vsel %vm13_vm12, %v135_v49, %v111_v31 }
  0x35   :  { %v138_v55 = vsel %vm12_vm13, 0, %v136_v52 }
  0x36   :  { %vm114_vm10 = vcmp.lt.s32.totalorder %v113_v33, 0  ;;  %v115_v34 = vsub.s32 0, %v113_v33  ;;  %v155_v60 = vadd.s32 3, %v138_v55 }
  0x38   :  { %v116_v35 = vsel %vm114_vm10, %v115_v34, %v113_v33  ;;  %v156_v2 = vand.u32 3, %v155_v60 }
  0x39   :  { %v117_v36 = vclz %v116_v35 }
  0x3a   :  { %vm161_vm14 = vcmp.eq.s32.totalorder %v156_v2, 2  ;;  %vm158_vm15 = vcmp.eq.s32.totalorder %v156_v2, 0  ;;  %vm157_vm0 = vcmp.lt.s32.totalorder %v156_v2, 2 }
  0x3b   :  { %v184_v37 = vadd.s32 4294967294, %v117_v36 }
  0x3d   :  { %vm185_vm11 = vcmp.lt.s32.totalorder %v184_v37, 0 }
  0x3e   :  { %v120_v38 = vsel %vm185_vm11, 0, %v184_v37 }
  0x3f   :  { %v121_v39 = vsub.s32 32, %v120_v38  ;;  %v122_v40 = vshll.u32 %v113_v33, %v120_v38  ;;  %v125_v41 = vsub.s32 4294967266, %v120_v38 }
  0x41   :  { %v123_v29 = vshrl.u32 %v105_v11, %v121_v39  ;;  %v126_v42 = vadd.s32 127, %v125_v41 }
  0x43   :  { %v124_v43 = vor.u32 %v123_v29, %v122_v40  ;;  %v127_v44 = vshll.u32 %v126_v42, 23 }
  0x45   :  { %v128_v45 = vor.u32 4788187, %v127_v44  ;;  %v131_v46 = vcvt.s32.f32 %v124_v43 }
  0x47   :  { %v129_v47 = vand.u32 2147483647, %v128_v45 }
  0x49   :  { %v132_v48 = vmul.f32 %v131_v46, %v129_v47 }
  0x4b   :  { %v133_v50 = vxor.u32 2147483648, %v132_v48 }
  0x4d   :  { %v134_v51 = vsel %vm13_vm12, %v133_v50, %v132_v48 }
  0x4e   :  { %v137_v53 = vsel %vm12_vm13, %v241_v1, %v134_v51 }
  0x4f   :  { %v139_v54 = vmul.f32 %v137_v53, %v137_v53 }
  0x51   :  { %v140_v56 = vmul.f32 -0.001358992, %v139_v54  ;;  %v147_v57 = vmul.f32 -0.00019511016, %v139_v54 }
  0x53   :  { %v141_v58 = vadd.f32 0.041655596, %v140_v56  ;;  %v148_v59 = vadd.f32 0.008332121, %v147_v57 }
  0x55   :  { %v142_v61 = vmul.f32 %v141_v58, %v139_v54  ;;  %v149_v62 = vmul.f32 %v148_v59, %v139_v54 }
  0x57   :  { %v143_v63 = vadd.f32 -0.4999988, %v142_v61  ;;  %v150_v0 = vadd.f32 -0.16666654, %v149_v62 }
  0x59   :  { %v144_v3 = vmul.f32 %v143_v63, %v139_v54  ;;  %v151_v5 = vmul.f32 %v150_v0, %v139_v54 }
  0x5b   :  { %v145_v4 = vadd.f32 1.0, %v144_v3  ;;  %v152_v6 = vadd.f32 1.0, %v151_v5 }
  0x5d   :  { %v153_v7 = vmul.f32 %v152_v6, %v137_v53  ;;  %v162_v8 = vxor.u32 2147483648, %v145_v4 }
  0x5f   :  { %v159_v9 = vxor.u32 2147483648, %v153_v7  ;;  %v163_v10 = vsel %vm161_vm14, %v162_v8, %v153_v7 }
  0x61   :  { %v160_v12 = vsel %vm158_vm15, %v145_v4, %v159_v9 }
  0x62   :  { %v164_v13 = vsel %vm157_vm0, %v160_v12, %v163_v10 }
  0x63   :  { %v165_v14 = vsel %vm154_vm1, nan, %v164_v13 }
  0x64   :  { %166 = vst [vmem:[#allocation2] sm:$0x3] %v165_v14 }
  0x65   :  { %177 = dma.vmem_to_hbm [thread:$0]  %s173_s8, 32, %s175_s11, [#allocation3]  }
  0x66   :  { %218 = dma.done.wait [#allocation3], 32  }
  0x67   :  { %219 = vsyncadd [#allocation3], 4294967264 }
  0x68   :  { %182 = vsyncpa [#allocation3], 1 }

</bundles_post_ra>
